<compile_context>
chip_gen: v7x
topology: tpu7x:2x2x1
jax: 0.10.0
libtpu: 0.0.40
codegen_flags: <defaults>
</compile_context>

<pallas_src>
import numpy as np
import jax
import jax.numpy as jnp
from jax import lax
from jax.experimental import pallas as pl
from jax.experimental.pallas import tpu as pltpu


def make_cru_kernel(C, UC, LC, UC2, LC2, H, W, K, HW, HW_pad, compute_dtype):
    pad_k = K // 2
    CL = C - LC2                                  # rows produced by PWC2
    inv_hw = np.float32(1.0 / HW)
    # tap shifts in flattened (H*W) index space: source index = i + s
    shifts = [(kh - pad_k) * W + (kw - pad_k) for kh in range(K) for kw in range(K)]
    padded = HW_pad != HW

    def kernel(x_ref, masks_ref, w_sq1_ref, w_sq2_ref, w_fused_ref,
               b_gwc_ref, w_pwc2_ref, o_ref):
        x = x_ref[0].astype(compute_dtype)                     # (C, HW_pad)
        up = x[:UC]
        low = x[UC:]

        # squeeze1 / squeeze2 : 1x1 convs == channel matmuls (MXU), f32 acc.
        up_sq = jnp.dot(w_sq1_ref[...], up,
                        preferred_element_type=jnp.float32)    # (UC2, HW_pad)
        low_sq = jnp.dot(w_sq2_ref[...], low,
                         preferred_element_type=jnp.float32)   # (LC2, HW_pad)
        up_sq_c = up_sq.astype(compute_dtype)
        low_sq_c = low_sq.astype(compute_dtype)

        # Stacked operand (K*K*UC2, HW_pad): per-tap lane roll (XLU) times a
        # precomputed boundary-validity mask (mask applied AFTER the roll so
        # wrapped lanes are zeroed).
        pieces = []
        for t, s in enumerate(shifts):
            if s == 0:
                rolled = up_sq_c
                if not padded:           # centre tap: all in-image lanes valid
                    pieces.append(rolled)
                    continue
            else:
                rolled = pltpu.roll(up_sq_c, shift=(-s) % HW_pad, axis=1)
            pieces.append(rolled * masks_ref[t])               # (UC2, HW_pad)
        stacked = jnp.concatenate(pieces, axis=0)              # (K*K*UC2, HW_pad)

        # Y1 = GWC(up_sq) + PWC1(up_sq) + bias  --  ONE fused MXU matmul
        # (PWC1 is folded into the centre-tap block of w_fused on the host).
        y1_nb = jnp.dot(w_fused_ref[...], stacked,
                        preferred_element_type=jnp.float32)    # (C, HW_pad)
        b = b_gwc_ref[...]                                     # (C, 1)
        y1 = y1_nb + b

        # PWC2(low_sq)
        y_pwc2 = jnp.dot(w_pwc2_ref[...], low_sq_c,
                         preferred_element_type=jnp.float32)   # (CL, HW_pad)

        # Channel attention: softmax over the 2C per-channel spatial means,
        # built from the three pieces -- no (2C, HW) intermediate, no channel
        # concat of full feature maps.  Pad lanes contribute 0 to every sum.
        m1 = jnp.sum(y1_nb, axis=1, keepdims=True) * inv_hw + b    # (C, 1)
        m2a = jnp.sum(y_pwc2, axis=1, keepdims=True) * inv_hw      # (CL, 1)
        m2b = jnp.sum(low_sq, axis=1, keepdims=True) * inv_hw      # (LC2, 1)
        m_all = jnp.concatenate([m1, m2a, m2b], axis=0)            # (2C, 1) tiny
        m_all = m_all - jnp.max(m_all, axis=0, keepdims=True)
        e = jnp.exp(m_all)
        # approx=False: exact reciprocal of a single scalar (approx vrcp error
        # could exceed the 1e-4 self-check tolerance; the cost is negligible).
        attn = e * pl.reciprocal(jnp.sum(e, axis=0, keepdims=True), approx=False)
        a1 = attn[:C]                                               # (C, 1)
        a2 = attn[C:]                                               # (C, 1)

        # out = softmax * cat(Y1, Y2); result = out[:C] + out[C:], written as
        # two channel slabs (Y2 = cat(PWC2(low_sq), low_sq) never materialized).
        o_ref[0, :CL] = (y1[:CL] * a1[:CL] + y_pwc2 * a2[:CL]).astype(o_ref.dtype)
        o_ref[0, CL:] = (y1[CL:] * a1[CL:] + low_sq * a2[CL:]).astype(o_ref.dtype)

    return kernel


def cru_forward(x, params, *, alpha=0.5, squeeze_radio=2, group_size=2,
                group_kernel_size=3, compute_dtype=jnp.float32):
    N, C, H, W = x.shape
    UC = int(alpha * C)
    LC = C - UC
    UC2 = UC // squeeze_radio
    LC2 = LC // squeeze_radio
    K = group_kernel_size
    HW = H * W
    HW_pad = ((HW + 127) // 128) * 128        # lane-dense (unmasked vst) blocks

    w_sq1, w_sq2, w_gwc, b_gwc, w_pwc1, w_pwc2 = params

    # ---------------- host-side (glue) weight / mask preparation ------------
    w_sq1_2d = jnp.asarray(w_sq1, jnp.float32).reshape(UC2, UC).astype(compute_dtype)
    w_sq2_2d = jnp.asarray(w_sq2, jnp.float32).reshape(LC2, LC).astype(compute_dtype)
    w_pwc2_2d = jnp.asarray(w_pwc2, jnp.float32).reshape(C - LC2, LC2).astype(compute_dtype)
    b_gwc_2d = jnp.asarray(b_gwc, jnp.float32).reshape(C, 1)

    # Fused GWC(+PWC1) weight, shape (C, K*K*UC2): block-diagonal grouped-conv
    # taps, with the dense PWC1 1x1 weight folded into the centre tap so Y1
    # becomes a single MXU matmul with a K*K*UC2-deep contraction.
    ocg = C // group_size
    icg = UC2 // group_size
    w_gwc_np = np.asarray(w_gwc, np.float32)
    w_pwc1_np = np.asarray(w_pwc1, np.float32).reshape(C, UC2)
    w_fused_np = np.zeros((C, K * K * UC2), np.float32)
    for g in range(group_size):
        for kh in range(K):
            for kw in range(K):
                t = kh * K + kw
                w_fused_np[g * ocg:(g + 1) * ocg,
                           t * UC2 + g * icg: t * UC2 + (g + 1) * icg] = \
                    w_gwc_np[g * ocg:(g + 1) * ocg, :, kh, kw]
    center = (K // 2) * K + (K // 2)
    w_fused_np[:, center * UC2:(center + 1) * UC2] += w_pwc1_np
    w_fused = jnp.asarray(w_fused_np).astype(compute_dtype)

    # Precomputed per-tap boundary-validity masks (K*K, 1, HW_pad): no iota /
    # div / mod / compares in-kernel; pad lanes (>= HW) are invalid for every
    # tap, so all in-kernel spatial sums over pad lanes are exactly zero.
    pad_k = K // 2
    idx = np.arange(HW_pad)
    hi = idx // W
    wi = idx % W
    in_img = idx < HW
    masks_np = np.zeros((K * K, 1, HW_pad), np.float32)
    for kh in range(K):
        for kw in range(K):
            dh, dw = kh - pad_k, kw - pad_k
            valid = (in_img & (hi + dh >= 0) & (hi + dh < H)
                     & (wi + dw >= 0) & (wi + dw < W))
            masks_np[kh * K + kw, 0] = valid.astype(np.float32)
    masks = jnp.asarray(masks_np).astype(compute_dtype)

    x_flat = x.reshape(N, C, HW)
    if HW_pad != HW:
        x_flat = jnp.pad(x_flat, ((0, 0), (0, 0), (0, HW_pad - HW)))

    kernel = make_cru_kernel(C, UC, LC, UC2, LC2, H, W, K, HW, HW_pad,
                             compute_dtype)

    def full_spec(arr):
        nd = arr.ndim
        return pl.BlockSpec(arr.shape, lambda n, _nd=nd: (0,) * _nd)

    flops = 2 * N * HW_pad * (UC2 * UC + LC2 * LC
                              + C * K * K * UC2 + (C - LC2) * LC2)
    bytes_accessed = 4 * (x_flat.size + N * C * HW_pad + w_fused.size
                          + masks.size + w_sq1_2d.size + w_sq2_2d.size
                          + w_pwc2_2d.size + b_gwc_2d.size)

    out_flat = pl.pallas_call(
        kernel,
        out_shape=jax.ShapeDtypeStruct((N, C, HW_pad), jnp.float32),
        grid_spec=pltpu.PrefetchScalarGridSpec(
            num_scalar_prefetch=0,
            grid=(N,),
            in_specs=[
                pl.BlockSpec((1, C, HW_pad), lambda n: (n, 0, 0)),
                full_spec(masks),
                full_spec(w_sq1_2d),
                full_spec(w_sq2_2d),
                full_spec(w_fused),
                full_spec(b_gwc_2d),
                full_spec(w_pwc2_2d),
            ],
            out_specs=pl.BlockSpec((1, C, HW_pad), lambda n: (n, 0, 0)),
        ),
        compiler_params=pltpu.CompilerParams(
            dimension_semantics=("parallel",)),   # batch images are independent
        cost_estimate=pl.CostEstimate(
            flops=int(flops),
            transcendentals=int(2 * C * N),
            bytes_accessed=int(bytes_accessed)),
    )(x_flat, masks, w_sq1_2d, w_sq2_2d, w_fused, b_gwc_2d, w_pwc2_2d)

    out = out_flat[..., :HW] if HW_pad != HW else out_flat
    return out.reshape(N, C, H, W)


# ----------------------------- pure-JAX reference -----------------------------

def _conv1x1(x, w):
    return lax.conv_general_dilated(x, w, (1, 1), 'VALID',
                                    dimension_numbers=('NCHW', 'OIHW', 'NCHW'))


def cru_reference(x, params, *, alpha=0.5, squeeze_radio=2, group_size=2,
                  group_kernel_size=3):
    N, C, H, W = x.shape
    UC = int(alpha * C)
    w_sq1, w_sq2, w_gwc, b_gwc, w_pwc1, w_pwc2 = params
    up, low = x[:, :UC], x[:, UC:]
    up_sq = _conv1x1(up, w_sq1)
    low_sq = _conv1x1(low, w_sq2)
    p = group_kernel_size // 2
    gwc = lax.conv_general_dilated(up_sq, w_gwc, (1, 1), [(p, p), (p, p)],
                                   dimension_numbers=('NCHW', 'OIHW', 'NCHW'),
                                   feature_group_count=group_size)
    gwc = gwc + b_gwc[None, :, None, None]
    y1 = gwc + _conv1x1(up_sq, w_pwc1)
    y2 = jnp.concatenate([_conv1x1(low_sq, w_pwc2), low_sq], axis=1)
    out = jnp.concatenate([y1, y2], axis=1)
    attn = jax.nn.softmax(jnp.mean(out, axis=(2, 3), keepdims=True), axis=1)
    out = attn * out
    return out[:, :C] + out[:, C:]


# ------------------------------------ main ------------------------------------

def init_params(key, op_channel, alpha=0.5, squeeze_radio=2, group_size=2,
                group_kernel_size=3):
    C = op_channel
    UC = int(alpha * C)
    LC = C - UC
    UC2 = UC // squeeze_radio
    LC2 = LC // squeeze_radio
    K = group_kernel_size
    ks = jax.random.split(key, 6)
    w_sq1 = 0.3 * jax.random.normal(ks[0], (UC2, UC, 1, 1), jnp.float32)
    w_sq2 = 0.3 * jax.random.normal(ks[1], (LC2, LC, 1, 1), jnp.float32)
    w_gwc = 0.3 * jax.random.normal(ks[2], (C, UC2 // group_size, K, K), jnp.float32)
    b_gwc = 0.1 * jax.random.normal(ks[3], (C,), jnp.float32)
    w_pwc1 = 0.3 * jax.random.normal(ks[4], (C, UC2, 1, 1), jnp.float32)
    w_pwc2 = 0.3 * jax.random.normal(ks[5], (C - LC2, LC2, 1, 1), jnp.float32)
    return (w_sq1, w_sq2, w_gwc, b_gwc, w_pwc1, w_pwc2)


if __name__ == "__main__":
    op_channel, N, H, W = 8, 2, 16, 16
    key = jax.random.PRNGKey(0)
    kx, kp = jax.random.split(key)
    x = jax.random.normal(kx, (N, op_channel, H, W), jnp.float32)
    params = init_params(kp, op_channel)

    # f32 compute keeps the 1e-4 check tight; pass compute_dtype=jnp.bfloat16
    # for v6e/v7x MXU throughput (f32 accumulation is kept either way).
    out = cru_forward(x, params, compute_dtype=jnp.float32)
    out = jax.block_until_ready(out)

    ref = cru_reference(x, params)
    np.testing.assert_allclose(np.asarray(out), np.asarray(ref),
                               rtol=1e-4, atol=1e-4)
    print("KERNEL_OK")
</pallas_src>

<mosaic_0001>
module attributes {stable_mosaic.version = 11 : i64} {
  func.func @kernel(%arg0: i32, %arg1: memref<1x8x256xf32, #tpu.memory_space<vmem>>, %arg2: memref<9x1x256xf32, #tpu.memory_space<vmem>>, %arg3: memref<2x4xf32, #tpu.memory_space<vmem>>, %arg4: memref<2x4xf32, #tpu.memory_space<vmem>>, %arg5: memref<8x18xf32, #tpu.memory_space<vmem>>, %arg6: memref<8x1xf32, #tpu.memory_space<vmem>>, %arg7: memref<6x2xf32, #tpu.memory_space<vmem>>, %arg8: memref<1x8x256xf32, #tpu.memory_space<vmem>>) attributes {dimension_semantics = [#tpu.dimension_semantics<parallel>], iteration_bounds = array<i64: 2>, scalar_prefetch = 0 : i64, scratch_operands = 0 : i64, tpu.core_type = #tpu.core_type<tc>, window_params = [{transform_indices = @transform_0, window_bounds = array<i64: 1, 8, 256>}, {pipeline_mode = #tpu.pipeline_mode<synchronous>, transform_indices = @transform_1, window_bounds = array<i64: 9, 1, 256>}, {pipeline_mode = #tpu.pipeline_mode<synchronous>, transform_indices = @transform_2, window_bounds = array<i64: 2, 4>}, {pipeline_mode = #tpu.pipeline_mode<synchronous>, transform_indices = @transform_3, window_bounds = array<i64: 2, 4>}, {pipeline_mode = #tpu.pipeline_mode<synchronous>, transform_indices = @transform_4, window_bounds = array<i64: 8, 18>}, {pipeline_mode = #tpu.pipeline_mode<synchronous>, transform_indices = @transform_5, window_bounds = array<i64: 8, 1>}, {pipeline_mode = #tpu.pipeline_mode<synchronous>, transform_indices = @transform_6, window_bounds = array<i64: 6, 2>}, {transform_indices = @transform_7, window_bounds = array<i64: 1, 8, 256>}]} {
    %c0 = arith.constant 0 : index
    %c0_0 = arith.constant 0 : index
    %c0_1 = arith.constant 0 : index
    %0 = vector.load %arg1[%c0, %c0_0, %c0_1] : memref<1x8x256xf32, #tpu.memory_space<vmem>>, vector<1x8x256xf32>
    %1 = vector.shape_cast %0 : vector<1x8x256xf32> to vector<8x256xf32>
    %2 = vector.extract_strided_slice %1 {offsets = [0, 0], sizes = [4, 256], strides = [1, 1]} : vector<8x256xf32> to vector<4x256xf32>
    %3 = vector.extract_strided_slice %1 {offsets = [4, 0], sizes = [4, 256], strides = [1, 1]} : vector<8x256xf32> to vector<4x256xf32>
    %c0_2 = arith.constant 0 : index
    %c0_3 = arith.constant 0 : index
    %4 = vector.load %arg3[%c0_2, %c0_3] : memref<2x4xf32, #tpu.memory_space<vmem>>, vector<2x4xf32>
    %cst = arith.constant dense<0.000000e+00> : vector<2x256xf32>
    %5 = tpu.matmul %4, %2, %cst {dimension_numbers = #tpu.dot_dimension_numbers<[1], [0], [0], [1], [0, 0, 1, 1], [], []>} : vector<2x4xf32>, vector<4x256xf32>, vector<2x256xf32> -> vector<2x256xf32>
    %c0_4 = arith.constant 0 : index
    %c0_5 = arith.constant 0 : index
    %6 = vector.load %arg4[%c0_4, %c0_5] : memref<2x4xf32, #tpu.memory_space<vmem>>, vector<2x4xf32>
    %cst_6 = arith.constant dense<0.000000e+00> : vector<2x256xf32>
    %7 = tpu.matmul %6, %3, %cst_6 {dimension_numbers = #tpu.dot_dimension_numbers<[1], [0], [0], [1], [0, 0, 1, 1], [], []>} : vector<2x4xf32>, vector<4x256xf32>, vector<2x256xf32> -> vector<2x256xf32>
    %c17_i32 = arith.constant 17 : i32
    %8 = tpu.dynamic_rotate %5 by %c17_i32 dim 1 : vector<2x256xf32>, i32 -> vector<2x256xf32>
    %c0_7 = arith.constant 0 : index
    %c0_8 = arith.constant 0 : index
    %c0_9 = arith.constant 0 : index
    %9 = vector.load %arg2[%c0_7, %c0_8, %c0_9] : memref<9x1x256xf32, #tpu.memory_space<vmem>>, vector<1x1x256xf32>
    %10 = vector.shape_cast %9 : vector<1x1x256xf32> to vector<1x256xf32>
    %11 = vector.broadcast %10 : vector<1x256xf32> to vector<2x256xf32>
    %12 = arith.mulf %8, %11 : vector<2x256xf32>
    %c16_i32 = arith.constant 16 : i32
    %13 = tpu.dynamic_rotate %5 by %c16_i32 dim 1 : vector<2x256xf32>, i32 -> vector<2x256xf32>
    %c1 = arith.constant 1 : index
    %c0_10 = arith.constant 0 : index
    %c0_11 = arith.constant 0 : index
    %14 = vector.load %arg2[%c1, %c0_10, %c0_11] : memref<9x1x256xf32, #tpu.memory_space<vmem>>, vector<1x1x256xf32>
    %15 = vector.shape_cast %14 : vector<1x1x256xf32> to vector<1x256xf32>
    %16 = vector.broadcast %15 : vector<1x256xf32> to vector<2x256xf32>
    %17 = arith.mulf %13, %16 : vector<2x256xf32>
    %c15_i32 = arith.constant 15 : i32
    %18 = tpu.dynamic_rotate %5 by %c15_i32 dim 1 : vector<2x256xf32>, i32 -> vector<2x256xf32>
    %c2 = arith.constant 2 : index
    %c0_12 = arith.constant 0 : index
    %c0_13 = arith.constant 0 : index
    %19 = vector.load %arg2[%c2, %c0_12, %c0_13] : memref<9x1x256xf32, #tpu.memory_space<vmem>>, vector<1x1x256xf32>
    %20 = vector.shape_cast %19 : vector<1x1x256xf32> to vector<1x256xf32>
    %21 = vector.broadcast %20 : vector<1x256xf32> to vector<2x256xf32>
    %22 = arith.mulf %18, %21 : vector<2x256xf32>
    %c1_i32 = arith.constant 1 : i32
    %23 = tpu.dynamic_rotate %5 by %c1_i32 dim 1 : vector<2x256xf32>, i32 -> vector<2x256xf32>
    %c3 = arith.constant 3 : index
    %c0_14 = arith.constant 0 : index
    %c0_15 = arith.constant 0 : index
    %24 = vector.load %arg2[%c3, %c0_14, %c0_15] : memref<9x1x256xf32, #tpu.memory_space<vmem>>, vector<1x1x256xf32>
    %25 = vector.shape_cast %24 : vector<1x1x256xf32> to vector<1x256xf32>
    %26 = vector.broadcast %25 : vector<1x256xf32> to vector<2x256xf32>
    %27 = arith.mulf %23, %26 : vector<2x256xf32>
    %c255_i32 = arith.constant 255 : i32
    %28 = tpu.dynamic_rotate %5 by %c255_i32 dim 1 : vector<2x256xf32>, i32 -> vector<2x256xf32>
    %c5 = arith.constant 5 : index
    %c0_16 = arith.constant 0 : index
    %c0_17 = arith.constant 0 : index
    %29 = vector.load %arg2[%c5, %c0_16, %c0_17] : memref<9x1x256xf32, #tpu.memory_space<vmem>>, vector<1x1x256xf32>
    %30 = vector.shape_cast %29 : vector<1x1x256xf32> to vector<1x256xf32>
    %31 = vector.broadcast %30 : vector<1x256xf32> to vector<2x256xf32>
    %32 = arith.mulf %28, %31 : vector<2x256xf32>
    %c241_i32 = arith.constant 241 : i32
    %33 = tpu.dynamic_rotate %5 by %c241_i32 dim 1 : vector<2x256xf32>, i32 -> vector<2x256xf32>
    %c6 = arith.constant 6 : index
    %c0_18 = arith.constant 0 : index
    %c0_19 = arith.constant 0 : index
    %34 = vector.load %arg2[%c6, %c0_18, %c0_19] : memref<9x1x256xf32, #tpu.memory_space<vmem>>, vector<1x1x256xf32>
    %35 = vector.shape_cast %34 : vector<1x1x256xf32> to vector<1x256xf32>
    %36 = vector.broadcast %35 : vector<1x256xf32> to vector<2x256xf32>
    %37 = arith.mulf %33, %36 : vector<2x256xf32>
    %c240_i32 = arith.constant 240 : i32
    %38 = tpu.dynamic_rotate %5 by %c240_i32 dim 1 : vector<2x256xf32>, i32 -> vector<2x256xf32>
    %c7 = arith.constant 7 : index
    %c0_20 = arith.constant 0 : index
    %c0_21 = arith.constant 0 : index
    %39 = vector.load %arg2[%c7, %c0_20, %c0_21] : memref<9x1x256xf32, #tpu.memory_space<vmem>>, vector<1x1x256xf32>
    %40 = vector.shape_cast %39 : vector<1x1x256xf32> to vector<1x256xf32>
    %41 = vector.broadcast %40 : vector<1x256xf32> to vector<2x256xf32>
    %42 = arith.mulf %38, %41 : vector<2x256xf32>
    %c239_i32 = arith.constant 239 : i32
    %43 = tpu.dynamic_rotate %5 by %c239_i32 dim 1 : vector<2x256xf32>, i32 -> vector<2x256xf32>
    %c8 = arith.constant 8 : index
    %c0_22 = arith.constant 0 : index
    %c0_23 = arith.constant 0 : index
    %44 = vector.load %arg2[%c8, %c0_22, %c0_23] : memref<9x1x256xf32, #tpu.memory_space<vmem>>, vector<1x1x256xf32>
    %45 = vector.shape_cast %44 : vector<1x1x256xf32> to vector<1x256xf32>
    %46 = vector.broadcast %45 : vector<1x256xf32> to vector<2x256xf32>
    %47 = arith.mulf %43, %46 : vector<2x256xf32>
    %48 = tpu.concatenate %12, %17, %22, %27, %5, %32, %37, %42, %47 in 0 : vector<2x256xf32>, vector<2x256xf32>, vector<2x256xf32>, vector<2x256xf32>, vector<2x256xf32>, vector<2x256xf32>, vector<2x256xf32>, vector<2x256xf32>, vector<2x256xf32> -> vector<18x256xf32>
    %c0_24 = arith.constant 0 : index
    %c0_25 = arith.constant 0 : index
    %49 = vector.load %arg5[%c0_24, %c0_25] : memref<8x18xf32, #tpu.memory_space<vmem>>, vector<8x18xf32>
    %cst_26 = arith.constant dense<0.000000e+00> : vector<8x256xf32>
    %50 = tpu.matmul %49, %48, %cst_26 {dimension_numbers = #tpu.dot_dimension_numbers<[1], [0], [0], [1], [0, 0, 1, 1], [], []>} : vector<8x18xf32>, vector<18x256xf32>, vector<8x256xf32> -> vector<8x256xf32>
    %c0_27 = arith.constant 0 : index
    %c0_28 = arith.constant 0 : index
    %51 = vector.load %arg6[%c0_27, %c0_28] : memref<8x1xf32, #tpu.memory_space<vmem>>, vector<8x1xf32>
    %52 = vector.broadcast %51 : vector<8x1xf32> to vector<8x256xf32>
    %53 = arith.addf %50, %52 : vector<8x256xf32>
    %c0_29 = arith.constant 0 : index
    %c0_30 = arith.constant 0 : index
    %54 = vector.load %arg7[%c0_29, %c0_30] : memref<6x2xf32, #tpu.memory_space<vmem>>, vector<6x2xf32>
    %cst_31 = arith.constant dense<0.000000e+00> : vector<6x256xf32>
    %55 = tpu.matmul %54, %7, %cst_31 {dimension_numbers = #tpu.dot_dimension_numbers<[1], [0], [0], [1], [0, 0, 1, 1], [], []>} : vector<6x2xf32>, vector<2x256xf32>, vector<6x256xf32> -> vector<6x256xf32>
    %cst_32 = arith.constant dense<0.000000e+00> : vector<8xf32>
    %56 = vector.multi_reduction <add>, %50, %cst_32 [1] : vector<8x256xf32> to vector<8xf32>
    %57 = vector.shape_cast %56 : vector<8xf32> to vector<8x1xf32>
    %cst_33 = arith.constant 3.906250e-03 : f32
    %58 = vector.broadcast %cst_33 : f32 to vector<8x1xf32>
    %59 = arith.mulf %57, %58 : vector<8x1xf32>
    %60 = arith.addf %59, %51 : vector<8x1xf32>
    %cst_34 = arith.constant dense<0.000000e+00> : vector<6xf32>
    %61 = vector.multi_reduction <add>, %55, %cst_34 [1] : vector<6x256xf32> to vector<6xf32>
    %62 = vector.shape_cast %61 : vector<6xf32> to vector<6x1xf32>
    %cst_35 = arith.constant 3.906250e-03 : f32
    %63 = vector.broadcast %cst_35 : f32 to vector<6x1xf32>
    %64 = arith.mulf %62, %63 : vector<6x1xf32>
    %cst_36 = arith.constant dense<0.000000e+00> : vector<2xf32>
    %65 = vector.multi_reduction <add>, %7, %cst_36 [1] : vector<2x256xf32> to vector<2xf32>
    %66 = vector.shape_cast %65 : vector<2xf32> to vector<2x1xf32>
    %cst_37 = arith.constant 3.906250e-03 : f32
    %67 = vector.broadcast %cst_37 : f32 to vector<2x1xf32>
    %68 = arith.mulf %66, %67 : vector<2x1xf32>
    %69 = tpu.concatenate %60, %64, %68 in 0 : vector<8x1xf32>, vector<6x1xf32>, vector<2x1xf32> -> vector<16x1xf32>
    %cst_38 = arith.constant dense<0xFF800000> : vector<1xf32>
    %70 = vector.multi_reduction <maximumf>, %69, %cst_38 [0] : vector<16x1xf32> to vector<1xf32>
    %71 = vector.shape_cast %70 : vector<1xf32> to vector<1x1xf32>
    %72 = vector.broadcast %71 : vector<1x1xf32> to vector<16x1xf32>
    %73 = arith.subf %69, %72 : vector<16x1xf32>
    %74 = math.exp %73 : vector<16x1xf32>
    %cst_39 = arith.constant dense<0.000000e+00> : vector<1xf32>
    %75 = vector.multi_reduction <add>, %74, %cst_39 [0] : vector<16x1xf32> to vector<1xf32>
    %76 = vector.shape_cast %75 : vector<1xf32> to vector<1x1xf32>
    %77 = tpu.reciprocal %76 : vector<1x1xf32> -> vector<1x1xf32>
    %78 = vector.broadcast %77 : vector<1x1xf32> to vector<16x1xf32>
    %79 = arith.mulf %74, %78 : vector<16x1xf32>
    %80 = vector.extract_strided_slice %79 {offsets = [0, 0], sizes = [8, 1], strides = [1, 1]} : vector<16x1xf32> to vector<8x1xf32>
    %81 = vector.extract_strided_slice %79 {offsets = [8, 0], sizes = [8, 1], strides = [1, 1]} : vector<16x1xf32> to vector<8x1xf32>
    %82 = vector.extract_strided_slice %53 {offsets = [0, 0], sizes = [6, 256], strides = [1, 1]} : vector<8x256xf32> to vector<6x256xf32>
    %83 = vector.extract_strided_slice %80 {offsets = [0, 0], sizes = [6, 1], strides = [1, 1]} : vector<8x1xf32> to vector<6x1xf32>
    %84 = vector.broadcast %83 : vector<6x1xf32> to vector<6x256xf32>
    %85 = arith.mulf %82, %84 : vector<6x256xf32>
    %86 = vector.extract_strided_slice %81 {offsets = [0, 0], sizes = [6, 1], strides = [1, 1]} : vector<8x1xf32> to vector<6x1xf32>
    %87 = vector.broadcast %86 : vector<6x1xf32> to vector<6x256xf32>
    %88 = arith.mulf %55, %87 : vector<6x256xf32>
    %89 = arith.addf %85, %88 : vector<6x256xf32>
    %c0_40 = arith.constant 0 : index
    %c0_41 = arith.constant 0 : index
    %c0_42 = arith.constant 0 : index
    %90 = vector.load %arg8[%c0_40, %c0_41, %c0_42] : memref<1x8x256xf32, #tpu.memory_space<vmem>>, vector<1x6x256xf32>
    %91 = vector.shape_cast %90 : vector<1x6x256xf32> to vector<6x256xf32>
    %92 = vector.shape_cast %89 : vector<6x256xf32> to vector<1x6x256xf32>
    tpu.vector_store %arg8[%c0_40, %c0_41, %c0_42], %92 {strides = array<i32>} : memref<1x8x256xf32, #tpu.memory_space<vmem>>, vector<1x6x256xf32>,
    %93 = vector.extract_strided_slice %53 {offsets = [6, 0], sizes = [2, 256], strides = [1, 1]} : vector<8x256xf32> to vector<2x256xf32>
    %94 = vector.extract_strided_slice %80 {offsets = [6, 0], sizes = [2, 1], strides = [1, 1]} : vector<8x1xf32> to vector<2x1xf32>
    %95 = vector.broadcast %94 : vector<2x1xf32> to vector<2x256xf32>
    %96 = arith.mulf %93, %95 : vector<2x256xf32>
    %97 = vector.extract_strided_slice %81 {offsets = [6, 0], sizes = [2, 1], strides = [1, 1]} : vector<8x1xf32> to vector<2x1xf32>
    %98 = vector.broadcast %97 : vector<2x1xf32> to vector<2x256xf32>
    %99 = arith.mulf %7, %98 : vector<2x256xf32>
    %100 = arith.addf %96, %99 : vector<2x256xf32>
    %c0_43 = arith.constant 0 : index
    %c6_44 = arith.constant 6 : index
    %c0_45 = arith.constant 0 : index
    %101 = vector.load %arg8[%c0_43, %c6_44, %c0_45] : memref<1x8x256xf32, #tpu.memory_space<vmem>>, vector<1x2x256xf32>
    %102 = vector.shape_cast %101 : vector<1x2x256xf32> to vector<2x256xf32>
    %103 = vector.shape_cast %100 : vector<2x256xf32> to vector<1x2x256xf32>
    tpu.vector_store %arg8[%c0_43, %c6_44, %c0_45], %103 {strides = array<i32>} : memref<1x8x256xf32, #tpu.memory_space<vmem>>, vector<1x2x256xf32>,
    return
  }
  func.func @transform_0(%arg0: i32) -> (i32, i32, i32) {
    %c0_i32 = arith.constant 0 : i32
    %c0_i32_0 = arith.constant 0 : i32
    %c0_i32_1 = arith.constant 0 : i32
    return %arg0, %c0_i32, %c0_i32_0 : i32, i32, i32
  }
  func.func @transform_1(%arg0: i32) -> (i32, i32, i32) {
    %c0_i32 = arith.constant 0 : i32
    %c0_i32_0 = arith.constant 0 : i32
    %c0_i32_1 = arith.constant 0 : i32
    %c0_i32_2 = arith.constant 0 : i32
    return %c0_i32, %c0_i32_0, %c0_i32_1 : i32, i32, i32
  }
  func.func @transform_2(%arg0: i32) -> (i32, i32) {
    %c0_i32 = arith.constant 0 : i32
    %c0_i32_0 = arith.constant 0 : i32
    %c0_i32_1 = arith.constant 0 : i32
    return %c0_i32, %c0_i32_0 : i32, i32
  }
  func.func @transform_3(%arg0: i32) -> (i32, i32) {
    %c0_i32 = arith.constant 0 : i32
    %c0_i32_0 = arith.constant 0 : i32
    %c0_i32_1 = arith.constant 0 : i32
    return %c0_i32, %c0_i32_0 : i32, i32
  }
  func.func @transform_4(%arg0: i32) -> (i32, i32) {
    %c0_i32 = arith.constant 0 : i32
    %c0_i32_0 = arith.constant 0 : i32
    %c0_i32_1 = arith.constant 0 : i32
    return %c0_i32, %c0_i32_0 : i32, i32
  }
  func.func @transform_5(%arg0: i32) -> (i32, i32) {
    %c0_i32 = arith.constant 0 : i32
    %c0_i32_0 = arith.constant 0 : i32
    %c0_i32_1 = arith.constant 0 : i32
    return %c0_i32, %c0_i32_0 : i32, i32
  }
  func.func @transform_6(%arg0: i32) -> (i32, i32) {
    %c0_i32 = arith.constant 0 : i32
    %c0_i32_0 = arith.constant 0 : i32
    %c0_i32_1 = arith.constant 0 : i32
    return %c0_i32, %c0_i32_0 : i32, i32
  }
  func.func @transform_7(%arg0: i32) -> (i32, i32, i32) {
    %c0_i32 = arith.constant 0 : i32
    %c0_i32_0 = arith.constant 0 : i32
    %c0_i32_1 = arith.constant 0 : i32
    return %arg0, %c0_i32, %c0_i32_0 : i32, i32, i32
  }
}

</mosaic_0001>

<bundles_post_ra>
// kernel: tpu_custom_call.1
= control target key start
LH: loop header
LB: loop body
LE: loop exit
PB: predicated region body
PF: predicated region fallthrough
CT: control target
= control target key end

     0   :  { %12 = vsyncpa [#allocation3], 0  ;;  %s1712_s0 = inlined_call_operand.hbm [shape: f32[2,8,256], index: 0, kind: input, shape index: {}]   ;;  %s1713_s1 = inlined_call_operand.vmem [shape: f32[9,1,256], index: 1, kind: input, shape index: {}]   ;;  %s1714_s2 = inlined_call_operand.hbm [shape: f32[2,4], index: 2, kind: input, shape index: {}]   ;;  %s1715_s3 = inlined_call_operand.vmem [shape: f32[2,4], index: 3, kind: input, shape index: {}]   ;;  %s1716_s4 = inlined_call_operand.vmem [shape: f32[8,18], index: 4, kind: input, shape index: {}]   ;;  %s1717_s5 = inlined_call_operand.vmem [shape: f32[8,1], index: 5, kind: input, shape index: {}]   ;;  %s1718_s6 = inlined_call_operand.vmem [shape: f32[6,2], index: 6, kind: input, shape index: {}]   ;;  %s1719_s7 = inlined_call_operand.hbm [shape: f32[2,8,256], index: 7, kind: output, shape index: {}]  }
   0x1   :  { %14 = vsyncpa [#allocation3 + $0x1], 0 }
   0x2   :  { %15 = vsyncpa [#allocation6], 0 }
   0x3   :  { %16 = vsyncpa [#allocation4], 0 }
   0x4   :  { %18 = vsyncpa [#allocation4 + $0x1], 0  ;;  %s1348_s24 = smov 0   ;;  %s1350_s25 = smov 0  }
   0x5   :  { %s1352_s26 = smov 0   ;;  %s1354_s27 = smov 0  }
   0x6 LB: > { %s1369_s28 = sadd.s32 4294967295, %s1293_s27   ;;  %s1049_s29 = sadd.s32 4294967294, %s1293_s27   ;;  %s1293_s27 = sphi %s1354_s27, %s1743_s27   ;;  %s1289_s26 = sphi %s1352_s26, %s1742_s26   ;;  %s1285_s25 = sphi %s1350_s25, %s1741_s25   ;;  %s1281_s24 = sphi %s1348_s24, %s1740_s24  }
   0x7   : > { %p44_p0 = scmp.ne.s32.totalorder %s1285_s25, %s1281_s24  ;;  %p1720_p1 = scmp.eq.s32.totalorder %s1369_s28, 0 }
   0x8   : > { %p200_p3 = scmp.eq.s32.totalorder %s1049_s29, 1  ;;  %p1050_p5 = scmp.ge.s32.totalorder %s1293_s27, 1 }
   0x9   : > { %p1378_p4 = por %p1720_p1, %p44_p0  ;;  %p207_p7 = scmp.lt.s32.totalorder %s1293_s27, 3 }
   0xa   : > { %p1383_p6 = por %p200_p3, %p44_p0  ;;  %s1295_s10 = smov [#allocation5]  }
   0xb   : > { %s1723_s30 = scalar_select %p1378_p4, 1, 0 }
   0xc   : > { %s1724_s8 = scalar_select %p1383_p6, 1, 0 }
   0xd   : > { %p1388_p8 = pnand %p1050_p5, %p207_p7  ;;  %s223_s11 = sshll.u32 %s1295_s10, 4  ;;  %s224_s11 = int_to_ptr.vmem [resolvable:$true] %s223_s11 }
   0xe   : > { %s1396_s12 = sadd.s32 1, %s1293_s27   ;;  %s31_s16 = sadd.s32 1, %s1289_s26 }
   0xf   : > { %s1725_s9 = scalar_select %p1388_p8, 1, 0 }
  0x10   : > { %p1098_p10 = pneg %p1388_p8  ;;  %s28_s14 = ssub.s32 %s1293_s27, %s1396_s12 }
  0x11   : > { %p1406_p12 = scmp.eq.s32.totalorder %s28_s14, 0  ;;  %s1165_s19 = scalar_lea.hbm %s1714_s2, 32 }
  0x12   : > { %p1400_p11 = pnand %p1098_p10, %p1720_p1  ;;  %p1166_p0 = scmp.ne.s32.totalorder %s1714_s2, %s1165_s19 }
  0x13   : > { %s1727_s15 = scalar_select %p1406_p12, 1, 0 }
  0x14   : > { %p1167_p3 = pneg %p1400_p11  ;;  %p1172_p10 = scmp.lt.u32.totalorder %s1165_s19, %s1714_s2 }
  0x16   : > { %p1168_p5 = pnand %p1167_p3, %p1166_p0 }
  0x18   : > { %p1169_p7 = pneg %p1168_p5 }
  0x1a   : > { %p1174_p9 = pnand %p1172_p10, %p1169_p7 }
  0x1c   : > { %1177 = shalt.err (!%p1174_p9)
}
  0x1d   : > { %s1178_s29 = scalar_lea.vmem %s224_s11, 32  ;;  %p1186_p6 = scmp.lt.s32.totalorder %s224_s11, %s224_s11 }
  0x1e   : > { %p1179_p1 = scmp.ne.s32.totalorder %s224_s11, %s1178_s29  ;;  %p1187_p4 = scmp.lt.s32.totalorder %s1178_s29, %s1178_s29 }
  0x20   : > { %p1181_p2 = pnand %p1179_p1, %p1167_p3  ;;  %p1188_p8 = por %p1187_p4, %p1186_p6 }
  0x22   : > { %p1182_p13 = pneg %p1181_p2 }
  0x24   : > { %p1189_p12 = pnand %p1188_p8, %p1182_p13 }
  0x26   : > { %1192 = shalt.err (!%p1189_p12)
}
  0x27   : > { %1101 = dma.hbm_to_vmem [thread:$0]  (!%p1400_p11), %s1714_s2, 32, %s224_s11, [#allocation6]  }
  0x28   : > { %p1728_p1 = scmp.ne.s32.totalorder %s1727_s15, 0  ;;  %p39_p2 = scmp.eq.s32.totalorder %s1293_s27, 0 }
  0x29   : > { %p1729_p4 = scmp.ne.s32.totalorder %s1289_s26, %s1285_s25  ;;  %p1730_p6 = scmp.eq.s32.totalorder %s1369_s28, 1 }
  0x2a   : > { %s1432_s17 = scalar_select %p1728_p1, %s1289_s26, %s31_s16  }
  0x2b   : > { %p1440_p8 = por %p1730_p6, %p1729_p4  ;;  %p1111_p9 = scmp.lt.s32.totalorder %s1293_s27, 2 }
  0x2c   : > { %s246_s18 = sand.u32 1, %s1289_s26   ;;  %p1732_p12 = pmov %p1729_p4 }
  0x2d   : > { %s1053_s19 = sshll.u32 %s246_s18, 4  ;;  %s1084_s20 = sshll.u32 %s1293_s27, 8 }
  0x2e   : > { %p40_p13 = por %p39_p2, %p1732_p12  ;;  %s1453_s11 = scalar_lea.hbm %s1712_s0, %s1084_s20 }
  0x2f   : > { %s250_s15 = scalar_lea.vmem [#allocation2], %s1053_s19  ;;  %s247_s29 = scalar_lea.sflag [#allocation3], %s246_s18 }
  0x30   : > { %s258_s16 = sshll.u32 %s250_s15, 4  ;;  %p1455_p11 = pnand %p1111_p9, %p40_p13  ;;  %s1459_s16 = int_to_ptr.vmem [resolvable:$true] %s258_s16 }
  0x31   : > { %s1193_s10 = scalar_lea.hbm %s1453_s11, 256  ;;  %s1198_s20 = scalar_lea.hbm %s1712_s0, 512 }
  0x32   : > { %p1194_p0 = scmp.ne.s32.totalorder %s1453_s11, %s1193_s10  ;;  %p1195_p3 = pneg %p1455_p11 }
  0x33   : > { %p1199_p10 = scmp.lt.u32.totalorder %s1453_s11, %s1712_s0  ;;  %p1200_p1 = scmp.lt.u32.totalorder %s1198_s20, %s1193_s10 }
  0x34   : > { %p1196_p5 = pnand %p1195_p3, %p1194_p0  ;;  %p1202_p4 = scmp.lt.u32.totalorder %s1193_s10, %s1453_s11 }
  0x35   : > { %p1201_p2 = por %p1200_p1, %p1199_p10 }
  0x36   : > { %p1197_p7 = pneg %p1196_p5 }
  0x37   : > { %p1203_p6 = por %p1202_p4, %p1201_p2 }
  0x39   : > { %p1204_p9 = pnand %p1203_p6, %p1197_p7 }
  0x3b   : > { %1207 = shalt.err (!%p1204_p9)
}
  0x3c   : > { %s1208_s18 = scalar_lea.vmem %s1459_s16, 256  ;;  %s1296_s15 = smov [#allocation2]  }
  0x3d   : > { %p1209_p12 = scmp.ne.s32.totalorder %s1459_s16, %s1208_s18  ;;  %s1213_s14 = sshll.u32 %s1296_s15, 4  ;;  %s1214_s14 = int_to_ptr.vmem [resolvable:$false] %s1213_s14 }
  0x3e   : > { %s1215_s19 = scalar_lea.vmem %s1214_s14, 512  ;;  %p1216_p5 = scmp.lt.s32.totalorder %s1459_s16, %s1214_s14 }
  0x3f   : > { %p1211_p13 = pnand %p1209_p12, %p1195_p3  ;;  %p1217_p10 = scmp.lt.s32.totalorder %s1215_s19, %s1208_s18 }
  0x41   : > { %p1212_p0 = pneg %p1211_p13  ;;  %p1218_p1 = por %p1217_p10, %p1216_p5 }
  0x43   : > { %p1219_p2 = pnand %p1218_p1, %p1212_p0 }
  0x45   : > { %1222 = shalt.err (!%p1219_p2)
}
  0x46   : > { %1105 = dma.hbm_to_vmem [thread:$0]  (!%p1455_p11), %s1453_s11, 256, %s1459_s16, %s247_s29  }
  0x47   : > { %p1734_p7 = scmp.ne.s32.totalorder %s1725_s9, 0 }
  0x48   : > { %s1489_s10 = sand.u32 (!%p1734_p7), 1, %s1285_s25   ;;  %p1735_p3 = scmp.ne.s32.totalorder (!%p1734_p7), %s1723_s30, 0 }
  0x49   : > { %267 = sbr.rel (%p1734_p7) target bundleno = 1023 (0x3ff), region = 48  ;;  %s1057_s20 = sshll.u32 (!%p1734_p7), %s1489_s10, 4 }
  0x4a   : > { %s270_s21 = scalar_lea.sflag (!%p1734_p7), [#allocation3], %s1489_s10  ;;  %s273_s22 = scalar_lea.vmem (!%p1734_p7), [#allocation2], %s1057_s20 }
  0x50   : > { %1268 = dma.done.wait (%p1735_p3), %s270_s21, 256  }
  0x51   : > { %1270 = vsyncadd (%p1735_p3), %s270_s21, 4294967040  ;;  %p1736_p11 = scmp.eq.s32.totalorder %s1369_s28, 0 }
  0x53   : > { %1272 = dma.done.wait (%p1736_p11), [#allocation6], 32   ;;  %p1737_p4 = pmov %p1736_p11 }
  0x54   : > { %v1297_v0 = vmov 0.0   ;;  %vm315_vm0 = vcmask 1043456   ;;  %v309_v1 = vld [vmem:[%s273_s22 + $0x8] sm:$0xff]  ;;  %v308_v2 = vld [vmem:[%s273_s22] sm:$0xff]  ;;  %vm311_vm1 = vcmask 31744   ;;  %s1298_s11 = smov 127   ;;  %v478_v17 = vlaneseq }
  0x55   : > { %1274 = vsyncadd (%p1737_p4), [#allocation6], 4294967264  ;;  %386 = vmatprep.mubr.f32.mxu0 %v1297_v0  ;;  %467 = vmatprep.mubr.f32.mxu1 %v1297_v0  ;;  %v310_v3 = vld [vmem:[#allocation5] sm:$0x3]  ;;  %v394_v4 = vrot.slane %v308_v2, 4  ;;  %v395_v5 = vrot.slane %v309_v1, 4 }
  0x56   : > { %1060 = vmatprep.subr.msk.mxu0 %vm315_vm0, %v309_v1  ;;  %v393_v6 = vld [vmem:[%s1715_s3] sm:$0x3]  ;;  %s1299_s16 = smov 16   ;;  %vm687_vm2 = vcmask 1041408   ;;  %vm792_vm3 = vcmask 15360   ;;  %s1300_s18 = smov 15  }
  0x57   : > { %1061 = vmatpush1.msk.msra.mxu0 %vm315_vm0, %v308_v2  ;;  %1063 = vmatprep.subr.msk.mxu1 %vm315_vm0, %v395_v5  ;;  %v791_v11 = vld [vmem:[%s1718_s6] sm:$0x3f]  ;;  %s1301_s15 = smov 113   ;;  %s1302_s14 = smov 17   ;;  %v486_v19 = vshrl.u32 %v478_v17, 7  ;;  %v1545_v21 = vand.u32 127, %v478_v17 }
  0x58   : > { %1062 = vmatmul.mubr.msk.f32.vlgmr.msra.gmra.mrb[0].mxu0 %vm311_vm1, %v310_v3  ;;  %1064 = vmatpush1.msk.msra.mxu1 %vm315_vm0, %v394_v4  ;;  %s1303_s19 = smov 1   ;;  %s1304_s21 = smov 112   ;;  %v1069_v26 = vld [vmem:[%s1713_s1 + $0xa] sm:$0x3]  ;;  %v1067_v27 = vld [vmem:[%s1713_s1 + $0x4] sm:$0x3] }
  0x59   : > { %776 = vmatprep.mubr.f32.mxu0 %v1297_v0  ;;  %1065 = vmatmul.mubr.msk.f32.vlgmr.msra.gmra.mrb[0].mxu1 %vm311_vm1, %v393_v6  ;;  %s1305_s22 = smov 111   ;;  %v1547_v23 = vsub.s32 0, %v486_v19  ;;  %v1549_v24 = vsub.s32 1, %v486_v19  ;;  %v1070_v28 = vld [vmem:[%s1713_s1 + $0xc] sm:$0x3]  ;;  %vm567_vm4 = vcmp.lt.s32.totalorder %v1545_v21, 127 }
  0x5a   : > { %866 = vmatprep.mubr.f32.mxu1 %v1297_v0  ;;  %v483_v30 = vld [vmem:[%s1713_s1] sm:$0x3]  ;;  %vm523_vm5 = vcmp.lt.s32.totalorder %v1545_v21, 15  ;;  %v1068_v35 = vld [vmem:[%s1713_s1 + $0x6] sm:$0x3]  ;;  %vm589_vm6 = vcmp.lt.s32.totalorder %v1545_v21, 113 }
  0x5b   : > { %v576_v31 = vrot.slane %v1069_v26, %v1547_v23  ;;  %v580_v32 = vrot.slane %v1069_v26, %v1549_v24  ;;  %v532_v33 = vrot.slane %v1067_v27, %v1547_v23  ;;  %v536_v36 = vrot.slane %v1067_v27, %v1549_v24  ;;  %v1066_v41 = vld [vmem:[%s1713_s1 + $0x2] sm:$0x3]  ;;  %v1071_v47 = vld [vmem:[%s1713_s1 + $0xe] sm:$0x3] }
  0x5c   : > { %v598_v37 = vrot.slane %v1070_v28, %v1547_v23  ;;  %v602_v38 = vrot.slane %v1070_v28, %v1549_v24  ;;  %vm480_vm7 = vcmp.lt.s32.totalorder %v1545_v21, 17  ;;  %v488_v39 = vrot.slane %v483_v30, %v1547_v23 }
  0x5d   : > { %v492_v40 = vrot.slane %v483_v30, %v1549_v24  ;;  %vm545_vm8 = vcmp.lt.s32.totalorder %v1545_v21, 1  ;;  %v554_v46 = vrot.slane %v1068_v35, %v1547_v23  ;;  %v558_v51 = vrot.slane %v1068_v35, %v1549_v24 }
  0x5e   : > { %vm501_vm9 = vcmp.lt.s32.totalorder %v1545_v21, 16  ;;  %v510_v53 = vrot.slane %v1066_v41, %v1547_v23  ;;  %v514_v54 = vrot.slane %v1066_v41, %v1549_v24  ;;  %vm611_vm10 = vcmp.lt.s32.totalorder %v1545_v21, 112 }
  0x5f   : > { %v620_v58 = vrot.slane %v1071_v47, %v1547_v23  ;;  %v624_v63 = vrot.slane %v1071_v47, %v1549_v24  ;;  %vm692_vm11 = vcmask 1045504   ;;  %vm633_vm12 = vcmp.lt.s32.totalorder %v1545_v21, 111 }
  0x60   : > { %vm702_vm13 = vcmask 146432   ;;  %vm894_vm14 = vcmask 7168  }
 0x12b   : > { %v1510_v7 = vpop.f32.mrb[0].mxu0 }
 0x12c   : > { %563 = vrot.lane.b32.xlu1 %v1510_v7, %s1298_s11  ;;  %497 = vrot.lane.b32.xlu0 %v1510_v7, %s1299_s16  ;;  %v1514_v8 = vpop.f32.mrb[1].mxu0  ;;  %v1516_v9 = vpop.f32.mrb[0].mxu1 }
 0x12d   : > { %v1518_v10 = vpop.f32.mrb[1].mxu1  ;;  %v884_v12 = vsel %vm687_vm2, %v1516_v9, 0.0 }
 0x12e   : > { %1076 = vmatprep.subr.msk.mxu1 %vm687_vm2, %v1518_v10  ;;  %v885_v13 = vsel %vm687_vm2, %v1518_v10, 0.0 }
 0x12f   : > { %1077 = vmatpush1.msk.msra.mxu1 %vm687_vm2, %v1516_v9  ;;  %v886_v14 = vadd.f32 %v885_v13, %v884_v12 }
 0x130   : > { %519 = vrot.lane.b32.xlu0 %v1510_v7, %s1300_s18  ;;  %565 = vrot.lane.b32.xlu1 %v1514_v8, %s1298_s11  ;;  %s1307_s11 = smov [#allocation7]  }
 0x131   : > { %1078 = vmatmul.mubr.msk.f32.vlgmr.msra.gmra.mrb[2].mxu1 %vm792_vm3, %v791_v11 }
 0x134   : > { %585 = vrot.lane.b32.xlu0 %v1510_v7, %s1301_s15  ;;  %521 = vrot.lane.b32.xlu1 %v1514_v8, %s1300_s18 }
 0x138   : > { %474 = vrot.lane.b32.xlu0 %v1510_v7, %s1302_s14  ;;  %587 = vrot.lane.b32.xlu1 %v1514_v8, %s1301_s15 }
 0x13c   : > { %541 = vrot.lane.b32.xlu0 %v1510_v7, %s1303_s19  ;;  %476 = vrot.lane.b32.xlu1 %v1514_v8, %s1302_s14  ;;  %s1085_s14 = sshll.u32 %s1369_s28, 8  ;;  %s955_s28 = scalar_lea.sflag [#allocation4], %s1489_s10 }
 0x13d   : > { %s1668_s9 = scalar_lea.hbm %s1719_s7, %s1085_s14 }
 0x140   : > { %499 = vrot.lane.b32.xlu0 %v1514_v8, %s1299_s16  ;;  %543 = vrot.lane.b32.xlu1 %v1514_v8, %s1303_s19  ;;  %s307_s19 = scalar_lea.vmem [#allocation7], %s1057_s20  ;;  %s1227_s16 = sshll.u32 %s1307_s11, 4  ;;  %s1228_s16 = int_to_ptr.vmem [resolvable:$false] %s1227_s16 }
 0x141   : > { %s1229_s23 = scalar_lea.vmem %s1228_s16, 512 }
 0x144   : > { %607 = vrot.lane.b32.xlu0 %v1510_v7, %s1304_s21  ;;  %609 = vrot.lane.b32.xlu1 %v1514_v8, %s1304_s21  ;;  %s969_s21 = sshll.u32 %s307_s19, 4  ;;  %s1670_s21 = int_to_ptr.vmem [resolvable:$true] %s969_s21 }
 0x145   : > { %s1223_s20 = scalar_lea.vmem %s1670_s21, 256  ;;  %p1230_p13 = scmp.lt.s32.totalorder %s1670_s21, %s1228_s16 }
 0x146   : > { %p1224_p6 = scmp.ne.s32.totalorder %s1670_s21, %s1223_s20  ;;  %p1231_p0 = scmp.lt.s32.totalorder %s1229_s23, %s1223_s20 }
 0x148   : > { %629 = vrot.lane.b32.xlu0 %v1510_v7, %s1305_s22  ;;  %631 = vrot.lane.b32.xlu1 %v1514_v8, %s1305_s22  ;;  %p1225_p9 = pnand %p1224_p6, %p1440_p8  ;;  %p1232_p5 = por %p1231_p0, %p1230_p13 }
 0x14a   : > { %p1226_p12 = pneg %p1225_p9 }
 0x14c   : > { %p1233_p10 = pnand %p1232_p5, %p1226_p12 }
 0x167   : > { %887 = vadd.xlane.f32.xlu0 %v886_v14 }
 0x19e   : > { %v564_v15 = vpop.permute.xlu1 %563  ;;  %v498_v16 = vpop.permute.xlu0 %497 }
 0x1a2   : > { %v520_v18 = vpop.permute.xlu0 %519  ;;  %v566_v20 = vpop.permute.xlu1 %565 }
 0x1a3   : > { %v568_v42 = vsel %vm567_vm4, %v564_v15, %v566_v20  ;;  %v569_v43 = vsel %vm567_vm4, %v566_v20, %v564_v15 }
 0x1a4   : > { %v583_v55 = vmul.f32 %v576_v31, %v568_v42  ;;  %v584_v56 = vmul.f32 %v580_v32, %v569_v43 }
 0x1a6   : > { %v586_v22 = vpop.permute.xlu0 %585  ;;  %v522_v25 = vpop.permute.xlu1 %521  ;;  %v671_v13 = vrot.slane %v583_v55, 6  ;;  %v672_v14 = vrot.slane %v584_v56, 6 }
 0x1a7   : > { %v525_v44 = vsel %vm523_vm5, %v522_v25, %v520_v18  ;;  %v524_v48 = vsel %vm523_vm5, %v520_v18, %v522_v25 }
 0x1a8   : > { %v539_v57 = vmul.f32 %v532_v33, %v525_v44  ;;  %v540_v59 = vmul.f32 %v536_v36, %v524_v48  ;;  %v1072_v36 = vld [vmem:[%s1713_s1 + $0x10] sm:$0x3]  ;;  %v696_v42 = vsel %vm687_vm2, %v1514_v8, %v672_v14 }
 0x1a9   : > { %v646_v48 = vrot.slane %v1072_v36, %v1549_v24  ;;  %v642_v55 = vrot.slane %v1072_v36, %v1547_v23 }
 0x1aa   : > { %v475_v29 = vpop.permute.xlu0 %474  ;;  %v588_v34 = vpop.permute.xlu1 %587  ;;  %v659_v15 = vrot.slane %v539_v57, 4  ;;  %v660_v26 = vrot.slane %v540_v59, 4 }
 0x1ab   : > { %v590_v49 = vsel %vm589_vm6, %v586_v22, %v588_v34  ;;  %v591_v52 = vsel %vm589_vm6, %v588_v34, %v586_v22 }
 0x1ac   : > { %v605_v60 = vmul.f32 %v598_v37, %v590_v49  ;;  %v606_v0 = vmul.f32 %v602_v38, %v591_v52  ;;  %v695_v38 = vsel %vm687_vm2, %v1510_v7, %v671_v13 }
 0x1ae   : > { %v542_v45 = vpop.permute.xlu0 %541  ;;  %v477_v50 = vpop.permute.xlu1 %476  ;;  %v677_v27 = vrot.slane %v605_v60, 4 }
 0x1af   : > { %v482_v61 = vsel %vm480_vm7, %v477_v50, %v475_v29  ;;  %v481_v1 = vsel %vm480_vm7, %v475_v29, %v477_v50 }
 0x1b0   : > { %v495_v17 = vmul.f32 %v488_v39, %v482_v61  ;;  %v496_v18 = vmul.f32 %v492_v40, %v481_v1  ;;  %v697_v47 = vsel %vm315_vm0, %v695_v38, %v677_v27 }
 0x1b2   : > { %v500_v62 = vpop.permute.xlu0 %499  ;;  %v544_v2 = vpop.permute.xlu1 %543 }
 0x1b3   : > { %v502_v3 = vsel %vm501_vm9, %v498_v16, %v500_v62  ;;  %v503_v4 = vsel %vm501_vm9, %v500_v62, %v498_v16  ;;  %v546_v5 = vsel %vm545_vm8, %v542_v45, %v544_v2  ;;  %v547_v6 = vsel %vm545_vm8, %v544_v2, %v542_v45  ;;  %v783_v2 = vld [vmem:[%s1717_s5] sm:$0xff] }
 0x1b4   : > { %v517_v11 = vmul.f32 %v510_v53, %v503_v4  ;;  %v518_v12 = vmul.f32 %v514_v54, %v502_v3  ;;  %v562_v19 = vmul.f32 %v558_v51, %v546_v5  ;;  %v678_v16 = vrot.slane %v606_v0, 4 }
 0x1b5   : > { %v561_v28 = vmul.f32 %v554_v46, %v547_v6  ;;  %v1306_v62 = vmov 0  }
 0x1b6   : > { %v653_v20 = vrot.slane %v517_v11, 6  ;;  %v654_v22 = vrot.slane %v518_v12, 6  ;;  %v608_v25 = vpop.permute.xlu0 %607  ;;  %v610_v29 = vpop.permute.xlu1 %609  ;;  %v666_v39 = vrot.slane %v562_v19, 2  ;;  %v698_v7 = vsel %vm315_vm0, %v696_v42, %v678_v16  ;;  %1158 = vset.pattern.permute.xlu1 %v1306_v62  ;;  %1157 = vset.pattern.permute.xlu0 %v1306_v62 }
 0x1b7   : > { %v612_v32 = vsel %vm611_vm10, %v608_v25, %v610_v29  ;;  %v613_v33 = vsel %vm611_vm10, %v610_v29, %v608_v25  ;;  %v665_v43 = vrot.slane %v561_v28, 2 }
 0x1b8   : > { %v688_v30 = vsel %vm687_vm2, %v495_v17, %v653_v20  ;;  %v689_v31 = vsel %vm687_vm2, %v496_v18, %v654_v22  ;;  %v627_v34 = vmul.f32 %v620_v58, %v612_v32  ;;  %v628_v35 = vmul.f32 %v624_v63, %v613_v33  ;;  %v701_v58 = vld [vmem:[%s1716_s4] sm:$0xff] }
 0x1b9   : > { %v691_v37 = vsel %vm315_vm0, %v689_v31, %v660_v26  ;;  %v690_v40 = vsel %vm315_vm0, %v688_v30, %v659_v15 }
 0x1ba   : > { %v630_v41 = vpop.permute.xlu0 %629  ;;  %v683_v44 = vrot.slane %v627_v34, 2  ;;  %v684_v45 = vrot.slane %v628_v35, 2  ;;  %v632_v46 = vpop.permute.xlu1 %631  ;;  %v694_v49 = vsel %vm692_vm11, %v691_v37, %v666_v39  ;;  %v693_v8 = vsel %vm692_vm11, %v690_v40, %v665_v43 }
 0x1bb   : > { %v635_v51 = vsel %vm633_vm12, %v632_v46, %v630_v41  ;;  %v634_v24 = vsel %vm633_vm12, %v630_v41, %v632_v46 }
 0x1bc   : > { %v699_v50 = vsel %vm692_vm11, %v697_v47, %v683_v44  ;;  %v700_v52 = vsel %vm692_vm11, %v698_v7, %v684_v45  ;;  %v650_v56 = vmul.f32 %v646_v48, %v635_v51  ;;  %v649_v57 = vmul.f32 %v642_v55, %v634_v24 }
 0x1bd   : > { %v1086_v53 = vpack.c.bf16 %v700_v52, %v694_v49  ;;  %v1088_v54 = vpack.c.bf16 %v699_v50, %v693_v8 }
 0x1bf   : > { %1087 = vmatprep.subr.bf16.mxu0 %v1086_v53 }
 0x1c0   : > { %1089 = vmatpush1.bf16.msra.mxu0 %v1088_v54 }
 0x1c1   : > { %1073 = vmatprep.subr.msk.mxu0 %vm687_vm2, %v650_v56 }
 0x1c4   : > { %1074 = vmatpush1.msk.msra.mxu0 %vm687_vm2, %v649_v57 }
 0x1c5   : > { %1075 = vmatmul.mubr.msk.f32.vlgmr.msra.gmra.mrb[2].mxu0 %vm702_vm13, %v701_v58 }
 0x1f4   : > { %v888_v3 = vpop.xlane.xlu0 %887 }
 0x1f5   : > { %v889_v5 = vmul.f32 0.00390625, %v888_v3 }
 0x1f7   : > { %v891_v11 = vrot.slane %v889_v5, 2 }
 0x204   : > { %v868_v59 = vpop.f32.mrb[2].mxu1 }
 0x205   : > { %v878_v23 = vsel %vm692_vm11, %v868_v59, 0.0  ;;  %v870_v60 = vpop.f32.mrb[3].mxu1 }
 0x206   : > { %v879_v21 = vsel %vm692_vm11, %v870_v60, 0.0 }
 0x207   : > { %v880_v61 = vadd.f32 %v879_v21, %v878_v23 }
 0x209   : > { %881 = vadd.xlane.f32.xlu0 %v880_v61 }
 0x296   : > { %v882_v4 = vpop.xlane.xlu0 %881 }
 0x297   : > { %v883_v6 = vmul.f32 0.00390625, %v882_v4 }
 0x298   : > { %v778_v63 = vpop.f32.mrb[2].mxu0 }
 0x299   : > { %v780_v0 = vpop.f32.mrb[3].mxu0  ;;  %v893_v14 = vsel %vm692_vm11, %v883_v6, %v891_v11 }
 0x29a   : > { %v873_v1 = vadd.f32 %v780_v0, %v778_v63  ;;  %v896_v17 = vsel %vm894_vm14, %v893_v14, -inf }
 0x29c   : > { %874 = vadd.xlane.f32.xlu1 %v873_v1 }
 0x2ad   : > { %786 = vperm.xlu1 %1158, %v783_v2  }
 0x329   : > { %v875_v12 = vpop.xlane.xlu1 %874 }
 0x32a   : > { %v876_v13 = vmul.f32 0.00390625, %v875_v12 }
 0x32c   : > { %v877_v15 = vadd.f32 %v876_v13, %v783_v2 }
 0x32d   : > { %v787_v46 = vpop.permute.xlu1 %786 }
 0x32e   : > { %v895_v18 = vsel %vm894_vm14, %v877_v15, -inf  ;;  %v789_v47 = vadd.f32 %v787_v46, %v778_v63  ;;  %v790_v48 = vadd.f32 %v787_v46, %v780_v0 }
 0x32f   : > { %v897_v19 = vmax.f32 %v895_v18, %v896_v17 }
 0x331   : > { %v898_v20 = vrot.slane %v897_v19, 4 }
 0x333   : > { %v899_v22 = vmax.f32 %v897_v19, %v898_v20 }
 0x335   : > { %v900_v25 = vrot.slane %v899_v22, 2 }
 0x337   : > { %v901_v26 = vmax.f32 %v899_v22, %v900_v25 }
 0x339   : > { %v902_v27 = vrot.slane %v901_v26, 1 }
 0x33b   : > { %v903_v16 = vmax.f32 %v901_v26, %v902_v27 }
 0x33d   : > { %v904_v28 = vsub.f32 %v877_v15, %v903_v16  ;;  %v905_v29 = vsub.f32 %v893_v14, %v903_v16 }
 0x33f   : > { %v906_v30 = vmul.f32 1.442695, %v904_v28  ;;  %v908_v31 = vmul.f32 1.442695, %v905_v29 }
 0x341   : > { %1159 = vpow2.f32 %v906_v30 }
 0x342   : > { %1161 = vpow2.f32 %v908_v31 }
 0x34b   : > { %v1160_v32 = vpop.eup %1159 }
 0x34c   : > { %v1162_v33 = vpop.eup %1161  ;;  %v910_v34 = vsel %vm894_vm14, %v1160_v32, 0.0 }
 0x34d   : > { %v911_v35 = vsel %vm894_vm14, %v1162_v33, 0.0 }
 0x34e   : > { %v912_v36 = vadd.f32 %v911_v35, %v910_v34 }
 0x350   : > { %v913_v37 = vrot.slane %v912_v36, 4 }
 0x352   : > { %v914_v38 = vadd.f32 %v913_v37, %v912_v36 }
 0x354   : > { %v915_v39 = vrot.slane %v914_v38, 2 }
 0x356   : > { %v916_v40 = vadd.f32 %v915_v39, %v914_v38 }
 0x358   : > { %v917_v41 = vrot.slane %v916_v40, 1 }
 0x35a   : > { %v918_v42 = vadd.f32 %v917_v41, %v916_v40 }
 0x35c   : > { %1163 = vrcp.f32 %v918_v42 }
 0x366   : > { %v1164_v43 = vpop.eup %1163 }
 0x367   : > { %v921_v44 = vmul.f32 %v1164_v43, %v1162_v33  ;;  %v920_v45 = vmul.f32 %v1164_v43, %v1160_v32 }
 0x369   : > { %931 = vperm.xlu0 %1157, %v921_v44   ;;  %924 = vperm.xlu1 %1158, %v920_v45  }
 0x3e8   : > { %v932_v49 = vpop.permute.xlu0 %931  ;;  %v925_v7 = vpop.permute.xlu1 %924 }
 0x3e9   : > { %v934_v50 = vmul.f32 %v932_v49, %v868_v59  ;;  %v935_v51 = vmul.f32 %v932_v49, %v870_v60  ;;  %v940_v52 = vrot.slane %v932_v49, 6  ;;  %v927_v8 = vmul.f32 %v925_v7, %v789_v47 }
 0x3ea   : > { %v928_v53 = vmul.f32 %v925_v7, %v790_v48 }
 0x3eb   : > { %v942_v54 = vmul.f32 %v940_v52, %v1516_v9  ;;  %v943_v55 = vmul.f32 %v940_v52, %v1518_v10  ;;  %v936_v24 = vadd.f32 %v934_v50, %v927_v8 }
 0x3ec   : > { %v937_v56 = vadd.f32 %v935_v51, %v928_v53 }
 0x3ed   : > { %v946_v57 = vrot.slane %v942_v54, 2  ;;  %v947_v58 = vrot.slane %v943_v55, 2  ;;  %938 = vst [vmem:[%s307_s19] sm:$0x3f] %v936_v24 }
 0x3ee   : > { %939 = vst [vmem:[%s307_s19 + $0x8] sm:$0x3f] %v937_v56 }
 0x3ef   : > { %v950_v59 = vadd.f32 %v946_v57, %v927_v8  ;;  %v951_v23 = vadd.f32 %v947_v58, %v928_v53 }
 0x3f1   : > { %952 = vst [vmem:[%s307_s19] sm:$0xc0] %v950_v59  ;;  %953 = vst [vmem:[%s307_s19 + $0x8] sm:$0xc0] %v951_v23 }
 0x3f2   : > { %1236 = shalt.err (!%p1233_p10)
}
 0x3f3   : > { %s1237_s10 = scalar_lea.hbm %s1668_s9, 256  ;;  %s1241_s15 = scalar_lea.hbm %s1719_s7, 512 }
 0x3f4   : > { %p1238_p1 = scmp.ne.s32.totalorder %s1668_s9, %s1237_s10  ;;  %p1242_p3 = scmp.lt.u32.totalorder %s1668_s9, %s1719_s7 }
 0x3f5   : > { %p1243_p11 = scmp.lt.u32.totalorder %s1241_s15, %s1237_s10  ;;  %p1245_p6 = scmp.lt.u32.totalorder %s1237_s10, %s1668_s9 }
 0x3f6   : > { %p1239_p2 = pnand %p1238_p1, %p1440_p8 }
 0x3f7   : > { %p1244_p4 = por %p1243_p11, %p1242_p3 }
 0x3f8   : > { %p1240_p7 = pneg %p1239_p2 }
 0x3f9   : > { %p1246_p9 = por %p1245_p6, %p1244_p4 }
 0x3fb   : > { %p1247_p12 = pnand %p1246_p9, %p1240_p7 }
 0x3fd   : > { %1250 = shalt.err (!%p1247_p12)
}
 0x3fe   : > { %1096 = dma.vmem_to_hbm [thread:$0]  (%p1440_p8), %s1670_s21, 256, %s1668_s9, %s955_s28  }
 0x3ff PF: > { %s981_s22 = sand.u32 1, %s1281_s24   ;;  %p1738_p13 = scmp.ne.s32.totalorder %s1724_s8, 0 }
 0x400   : > { %p1739_p0 = scmp.ge.s32.totalorder %s1293_s27, 2  ;;  %s982_s30 = scalar_lea.sflag [#allocation4], %s981_s22 }
 0x402   : > { %p1107_p5 = pnand %p1739_p0, %p1738_p13 }
 0x404   : > { %1276 = dma.done.wait (!%p1107_p5), %s982_s30, 256  }
 0x405   : > { %1278 = vsyncadd (!%p1107_p5), %s982_s30, 4294967040  ;;  %p21_p10 = scmp.ge.s32.totalorder %s1396_s12, 4   ;;  %s1740_s24 = smov %s1285_s25 }
 0x406   : > { %s1741_s25 = smov %s1289_s26  ;;  %s1742_s26 = smov %s1432_s17 }
 0x407   : > { %s1743_s27 = smov %s1396_s12  ;;  %23 = sbr.rel (!%p21_p10) target bundleno = 6 (0x6), region = 104 }
 0x40e   :  { %987 = vsyncpa [#allocation3], 1 }
 0x40f   :  { %989 = vsyncpa [#allocation3 + $0x1], 1 }
 0x410   :  { %990 = vsyncpa [#allocation6], 1 }
 0x411   :  { %991 = vsyncpa [#allocation4], 1 }
 0x412   :  { %993 = vsyncpa [#allocation4 + $0x1], 1 }

</bundles_post_ra>
